<compile_context>
chip_gen: v7x
topology: tpu7x:2x2x1
jax: 0.10.0
libtpu: 0.0.40
codegen_flags: <defaults>
</compile_context>

<pallas_src>
import functools

import jax
import jax.numpy as jnp
from jax.experimental import pallas as pl
from jax.experimental.pallas import tpu as pltpu


def _round_up(x, m):
    return ((x + m - 1) // m) * m


def _linear_kernel(img_ref, w_ref, b_ref, out_ref):
    """One batch tile of the Linear(1536, d) layer.

    img_ref : [TB, F] f32 VMEM tile (auto-pipelined, double-buffered)
    w_ref   : [F, d]  f32 VMEM (constant index_map -> resident across tiles)
    b_ref   : [1, d]  f32 VMEM (resident)
    out_ref : [TB, d] f32 output tile
    """
    acc = jnp.dot(img_ref[...], w_ref[...], preferred_element_type=jnp.float32)
    out_ref[...] = (acc + b_ref[...]).astype(out_ref.dtype)


def image_autorship_embedding_block(users, emb_table, w, b, images, *, tb_max=512):
    """users:[B] int, emb_table:[nusers,d] f32, w:[1536,d] f32, b:[d] f32, images:[B,1536] f32."""
    B, F = images.shape
    nusers, d = emb_table.shape
    assert w.shape == (F, d)

    users = users.astype(jnp.int32)
    # Embedding lookup via XLA gather: only B*d*4 bytes; avoids 2*TB tiny DMA
    # descriptors + per-row semaphore waits per tile in the kernel (review item).
    u_emb = jnp.take(emb_table, users, axis=0)

    # ---- batch tiling for the image Linear -------------------------------
    tb = min(tb_max, _round_up(B, 8))                    # f32 tiles -> multiple of 8 rows
    if B > 8 and _round_up(B, tb) // tb < 2:             # ensure >=2 tiles when batch allows
        tb = max(8, _round_up((B + 1) // 2, 8))          # (keeps both v7x TCs busy)
    b_pad = _round_up(B, tb)
    images_p = jnp.pad(images, ((0, b_pad - B), (0, 0))) if b_pad != B else images

    b2 = b.reshape(1, d).astype(jnp.float32)
    grid = (b_pad // tb,)

    flops = 2 * b_pad * F * d
    bytes_accessed = (images_p.size * images_p.dtype.itemsize   # images (dominant)
                      + w.size * w.dtype.itemsize               # weight (once)
                      + b2.size * b2.dtype.itemsize             # bias
                      + b_pad * d * 4)                          # output

    # Explicit VMEM budget: double-buffered image tile dominates.  Safe on v5e's
    # 16 MiB scoped default and well under v7x's 64 MiB physical VMEM.
    itemsize = images_p.dtype.itemsize
    vmem_need = (2 * tb * F * itemsize            # image tile x 2 buffers
                 + 2 * F * d * w.dtype.itemsize   # weight
                 + 2 * tb * d * 4                 # output tile x 2 buffers
                 + 2 * d * 4 + 4096)              # bias + slack
    vmem_limit = int(min(max(2 * vmem_need, 16 * 1024 * 1024), 48 * 1024 * 1024))

    img_emb = pl.pallas_call(
        _linear_kernel,
        out_shape=jax.ShapeDtypeStruct((b_pad, d), jnp.float32),
        grid_spec=pltpu.PrefetchScalarGridSpec(
            num_scalar_prefetch=0,
            grid=grid,
            in_specs=[
                pl.BlockSpec((tb, F), lambda i: (i, 0)),   # image tile (pipelined)
                pl.BlockSpec((F, d), lambda i: (0, 0)),    # weight (VMEM-resident)
                pl.BlockSpec((1, d), lambda i: (0, 0)),    # bias   (VMEM-resident)
            ],
            out_specs=pl.BlockSpec((tb, d), lambda i: (i, 0)),
        ),
        compiler_params=pltpu.CompilerParams(
            dimension_semantics=("parallel",),             # shard batch tiles across TCs
            vmem_limit_bytes=vmem_limit),
        cost_estimate=pl.CostEstimate(flops=flops, transcendentals=0,
                                      bytes_accessed=bytes_accessed),
    )(images_p, w, b2)

    if b_pad != B:
        img_emb = img_emb[:B]
    return u_emb, img_emb


if __name__ == "__main__":
    # module hyper-params (small, consistent with the forward pass)
    d = 32
    nusers = 64
    B = 8
    F = 1536          # fixed by nn.Linear(1536, d)
    initrange = 0.05

    key = jax.random.PRNGKey(0)
    k_emb, k_w, k_u, k_img = jax.random.split(key, 4)

    # deterministic parameter init (uniform(-initrange, initrange), bias = 0)
    emb_table = jax.random.uniform(k_emb, (nusers, d), jnp.float32,
                                   minval=-initrange, maxval=initrange)
    w_pt = jax.random.uniform(k_w, (d, F), jnp.float32,
                              minval=-initrange, maxval=initrange)   # PyTorch [d, 1536]
    w = w_pt.T                                                       # [1536, d]
    b = jnp.zeros((d,), jnp.float32)

    # inputs
    users = jax.random.randint(k_u, (B,), 0, nusers, dtype=jnp.int32)
    images = jax.random.normal(k_img, (B, F), jnp.float32)

    u_emb, img_emb = image_autorship_embedding_block(users, emb_table, w, b, images)
    u_emb, img_emb = jax.block_until_ready((u_emb, img_emb))

    # reference: exact gather; f32 matmul at highest precision
    u_ref = emb_table[users]
    img_ref = jnp.dot(images, w, precision=jax.lax.Precision.HIGHEST) + b

    assert u_emb.shape == (B, d) and img_emb.shape == (B, d)
    assert jnp.allclose(u_emb, u_ref, atol=1e-6)
    assert jnp.allclose(img_emb, img_ref, atol=1e-2, rtol=1e-2)

    print("KERNEL_OK")
</pallas_src>

<mosaic_0001>
module attributes {stable_mosaic.version = 11 : i64} {
  func.func @_linear_kernel(%arg0: i32, %arg1: memref<8x1536xf32, #tpu.memory_space<vmem>>, %arg2: memref<1536x32xf32, #tpu.memory_space<vmem>>, %arg3: memref<1x32xf32, #tpu.memory_space<vmem>>, %arg4: memref<8x32xf32, #tpu.memory_space<vmem>>) attributes {dimension_semantics = [#tpu.dimension_semantics<parallel>], iteration_bounds = array<i64: 1>, scalar_prefetch = 0 : i64, scratch_operands = 0 : i64, tpu.core_type = #tpu.core_type<tc>, window_params = [{transform_indices = @transform_0, window_bounds = array<i64: 8, 1536>}, {pipeline_mode = #tpu.pipeline_mode<synchronous>, transform_indices = @transform_1, window_bounds = array<i64: 1536, 32>}, {pipeline_mode = #tpu.pipeline_mode<synchronous>, transform_indices = @transform_2, window_bounds = array<i64: 1, 32>}, {transform_indices = @transform_3, window_bounds = array<i64: 8, 32>}]} {
    %c0 = arith.constant 0 : index
    %c0_0 = arith.constant 0 : index
    %0 = vector.load %arg1[%c0, %c0_0] : memref<8x1536xf32, #tpu.memory_space<vmem>>, vector<8x1536xf32>
    %c0_1 = arith.constant 0 : index
    %c0_2 = arith.constant 0 : index
    %1 = vector.load %arg2[%c0_1, %c0_2] : memref<1536x32xf32, #tpu.memory_space<vmem>>, vector<1536x32xf32>
    %cst = arith.constant dense<0.000000e+00> : vector<8x32xf32>
    %2 = tpu.matmul %0, %1, %cst {dimension_numbers = #tpu.dot_dimension_numbers<[1], [0], [0], [1], [0, 0, 1, 1], [], []>} : vector<8x1536xf32>, vector<1536x32xf32>, vector<8x32xf32> -> vector<8x32xf32>
    %c0_3 = arith.constant 0 : index
    %c0_4 = arith.constant 0 : index
    %3 = vector.load %arg3[%c0_3, %c0_4] : memref<1x32xf32, #tpu.memory_space<vmem>>, vector<1x32xf32>
    %4 = vector.broadcast %3 : vector<1x32xf32> to vector<8x32xf32>
    %5 = arith.addf %2, %4 : vector<8x32xf32>
    %c0_5 = arith.constant 0 : index
    %c0_6 = arith.constant 0 : index
    %6 = vector.load %arg4[%c0_5, %c0_6] : memref<8x32xf32, #tpu.memory_space<vmem>>, vector<8x32xf32>
    tpu.vector_store %arg4[%c0_5, %c0_6], %5 {strides = array<i32>} : memref<8x32xf32, #tpu.memory_space<vmem>>, vector<8x32xf32>,
    return
  }
  func.func @transform_0(%arg0: i32) -> (i32, i32) {
    %c0_i32 = arith.constant 0 : i32
    %c0_i32_0 = arith.constant 0 : i32
    return %arg0, %c0_i32 : i32, i32
  }
  func.func @transform_1(%arg0: i32) -> (i32, i32) {
    %c0_i32 = arith.constant 0 : i32
    %c0_i32_0 = arith.constant 0 : i32
    %c0_i32_1 = arith.constant 0 : i32
    return %c0_i32, %c0_i32_0 : i32, i32
  }
  func.func @transform_2(%arg0: i32) -> (i32, i32) {
    %c0_i32 = arith.constant 0 : i32
    %c0_i32_0 = arith.constant 0 : i32
    %c0_i32_1 = arith.constant 0 : i32
    return %c0_i32, %c0_i32_0 : i32, i32
  }
  func.func @transform_3(%arg0: i32) -> (i32, i32) {
    %c0_i32 = arith.constant 0 : i32
    %c0_i32_0 = arith.constant 0 : i32
    return %arg0, %c0_i32 : i32, i32
  }
}

</mosaic_0001>

<bundles_post_ra>
// kernel: tpu_custom_call.1
= control target key start
LH: loop header
LB: loop body
LE: loop exit
PB: predicated region body
PF: predicated region fallthrough
CT: control target
= control target key end

     0   :  { %s1738_s0 = inlined_call_operand.vmem [shape: f32[8,1536], index: 0, kind: input, shape index: {}]   ;;  %s1739_s1 = inlined_call_operand.vmem [shape: f32[1536,32], index: 1, kind: input, shape index: {}]   ;;  %s1740_s2 = inlined_call_operand.vmem [shape: f32[1,32], index: 2, kind: input, shape index: {}]   ;;  %s1741_s3 = inlined_call_operand.hbm [shape: f32[8,32], index: 3, kind: output, shape index: {}]  }
   0x1   :  { %v43_v0 = vld [vmem:[%s1739_s1 + $0x80] sm:$0xff]  ;;  %v44_v1 = vld [vmem:[%s1739_s1 + $0x88] sm:$0xff]  ;;  %v45_v11 = vld [vmem:[%s1739_s1 + $0x90] sm:$0xff] }
   0x2   :  { %v27_v2 = vld [vmem:[%s1739_s1] sm:$0xff]  ;;  %v873_v3 = vpack.c.bf16 %v44_v1, %v43_v0  ;;  %v28_v4 = vld [vmem:[%s1739_s1 + $0x8] sm:$0xff]  ;;  %v46_v13 = vld [vmem:[%s1739_s1 + $0x98] sm:$0xff] }
   0x3   :  { %v75_v5 = vld [vmem:[%s1739_s1 + $0x180] sm:$0xff]  ;;  %v76_v6 = vld [vmem:[%s1739_s1 + $0x188] sm:$0xff]  ;;  %v875_v7 = vpack.c.bf16 %v28_v4, %v27_v2  ;;  %v29_v14 = vld [vmem:[%s1739_s1 + $0x10] sm:$0xff]  ;;  %v877_v16 = vpack.c.bf16 %v46_v13, %v45_v11 }
   0x4   :  { %v905_v8 = vpack.c.bf16 %v76_v6, %v75_v5  ;;  %v59_v9 = vld [vmem:[%s1739_s1 + $0x100] sm:$0xff]  ;;  %v60_v10 = vld [vmem:[%s1739_s1 + $0x108] sm:$0xff]  ;;  %874 = vmatprep.subr.bf16.mxu0 %v873_v3  ;;  %v30_v15 = vld [vmem:[%s1739_s1 + $0x18] sm:$0xff] }
   0x5   :  { %v907_v12 = vpack.c.bf16 %v60_v10, %v59_v9  ;;  %876 = vmatpush3.bf16.msra.mxu0 %v875_v7  ;;  %v879_v17 = vpack.c.bf16 %v30_v15, %v29_v14  ;;  %v77_v18 = vld [vmem:[%s1739_s1 + $0x190] sm:$0xff]  ;;  %v78_v19 = vld [vmem:[%s1739_s1 + $0x198] sm:$0xff]  ;;  %v47_v23 = vld [vmem:[%s1739_s1 + $0xa0] sm:$0xff] }
   0x6   :  { %906 = vmatprep.subr.bf16.mxu1 %v905_v8  ;;  %v61_v20 = vld [vmem:[%s1739_s1 + $0x110] sm:$0xff]  ;;  %v909_v21 = vpack.c.bf16 %v78_v19, %v77_v18  ;;  %v62_v22 = vld [vmem:[%s1739_s1 + $0x118] sm:$0xff]  ;;  %v48_v24 = vld [vmem:[%s1739_s1 + $0xa8] sm:$0xff]  ;;  %878 = vmatprep.subr.bf16.mxu0 %v877_v16 }
   0x7   :  { %908 = vmatpush3.bf16.msra.mxu1 %v907_v12  ;;  %v911_v25 = vpack.c.bf16 %v62_v22, %v61_v20  ;;  %v881_v26 = vpack.c.bf16 %v48_v24, %v47_v23  ;;  %v31_v27 = vld [vmem:[%s1739_s1 + $0x20] sm:$0xff]  ;;  %v32_v28 = vld [vmem:[%s1739_s1 + $0x28] sm:$0xff]  ;;  %v49_v35 = vld [vmem:[%s1739_s1 + $0xb0] sm:$0xff] }
   0x8   :  { %v79_v29 = vld [vmem:[%s1739_s1 + $0x1a0] sm:$0xff]  ;;  %910 = vmatprep.subr.bf16.mxu1 %v909_v21  ;;  %v80_v30 = vld [vmem:[%s1739_s1 + $0x1a8] sm:$0xff]  ;;  %v883_v33 = vpack.c.bf16 %v32_v28, %v31_v27  ;;  %v50_v36 = vld [vmem:[%s1739_s1 + $0xb8] sm:$0xff] }
   0x9   :  { %v63_v31 = vld [vmem:[%s1739_s1 + $0x120] sm:$0xff]  ;;  %v64_v32 = vld [vmem:[%s1739_s1 + $0x128] sm:$0xff]  ;;  %880 = vmatpush3.bf16.msra.mxu0 %v879_v17  ;;  %v913_v34 = vpack.c.bf16 %v80_v30, %v79_v29  ;;  %v33_v37 = vld [vmem:[%s1739_s1 + $0x30] sm:$0xff]  ;;  %v885_v39 = vpack.c.bf16 %v50_v36, %v49_v35 }
   0xa   :  { %882 = vmatprep.subr.bf16.mxu0 %v881_v26  ;;  %v915_v38 = vpack.c.bf16 %v64_v32, %v63_v31  ;;  %v34_v40 = vld [vmem:[%s1739_s1 + $0x38] sm:$0xff]  ;;  %v81_v41 = vld [vmem:[%s1739_s1 + $0x1b0] sm:$0xff]  ;;  %v51_v46 = vld [vmem:[%s1739_s1 + $0xc0] sm:$0xff] }
   0xb   :  { %912 = vmatpush3.bf16.msra.mxu1 %v911_v25  ;;  %v82_v42 = vld [vmem:[%s1739_s1 + $0x1b8] sm:$0xff]  ;;  %v65_v44 = vld [vmem:[%s1739_s1 + $0x130] sm:$0xff]  ;;  %v52_v47 = vld [vmem:[%s1739_s1 + $0xc8] sm:$0xff]  ;;  %v887_v48 = vpack.c.bf16 %v34_v40, %v33_v37 }
   0xc   :  { %914 = vmatprep.subr.bf16.mxu1 %v913_v34  ;;  %v917_v43 = vpack.c.bf16 %v82_v42, %v81_v41  ;;  %v66_v45 = vld [vmem:[%s1739_s1 + $0x138] sm:$0xff]  ;;  %v83_v49 = vld [vmem:[%s1739_s1 + $0x1c0] sm:$0xff]  ;;  %v84_v50 = vld [vmem:[%s1739_s1 + $0x1c8] sm:$0xff]  ;;  %v889_v52 = vpack.c.bf16 %v52_v47, %v51_v46 }
   0xd   :  { %884 = vmatpush3.bf16.msra.mxu0 %v883_v33  ;;  %v919_v51 = vpack.c.bf16 %v66_v45, %v65_v44  ;;  %v35_v53 = vld [vmem:[%s1739_s1 + $0x40] sm:$0xff]  ;;  %v36_v54 = vld [vmem:[%s1739_s1 + $0x48] sm:$0xff]  ;;  %v921_v56 = vpack.c.bf16 %v84_v50, %v83_v49  ;;  %v53_v58 = vld [vmem:[%s1739_s1 + $0xd0] sm:$0xff] }
   0xe   :  { %886 = vmatprep.subr.bf16.mxu0 %v885_v39  ;;  %v67_v55 = vld [vmem:[%s1739_s1 + $0x140] sm:$0xff]  ;;  %v68_v57 = vld [vmem:[%s1739_s1 + $0x148] sm:$0xff]  ;;  %v54_v59 = vld [vmem:[%s1739_s1 + $0xd8] sm:$0xff]  ;;  %v891_v62 = vpack.c.bf16 %v36_v54, %v35_v53 }
   0xf   :  { %916 = vmatpush3.bf16.msra.mxu1 %v915_v38  ;;  %v85_v60 = vld [vmem:[%s1739_s1 + $0x1d0] sm:$0xff]  ;;  %v86_v61 = vld [vmem:[%s1739_s1 + $0x1d8] sm:$0xff]  ;;  %v923_v63 = vpack.c.bf16 %v68_v57, %v67_v55  ;;  %v893_v0 = vpack.c.bf16 %v54_v59, %v53_v58  ;;  %v55_v6 = vld [vmem:[%s1739_s1 + $0xe0] sm:$0xff] }
  0x10   :  { %918 = vmatprep.subr.bf16.mxu1 %v917_v43  ;;  %v37_v1 = vld [vmem:[%s1739_s1 + $0x50] sm:$0xff]  ;;  %v38_v2 = vld [vmem:[%s1739_s1 + $0x58] sm:$0xff]  ;;  %v925_v4 = vpack.c.bf16 %v86_v61, %v85_v60  ;;  %v56_v7 = vld [vmem:[%s1739_s1 + $0xe8] sm:$0xff] }
  0x11   :  { %888 = vmatpush3.bf16.msra.mxu0 %v887_v48  ;;  %v69_v3 = vld [vmem:[%s1739_s1 + $0x150] sm:$0xff]  ;;  %v70_v5 = vld [vmem:[%s1739_s1 + $0x158] sm:$0xff]  ;;  %v87_v8 = vld [vmem:[%s1739_s1 + $0x1e0] sm:$0xff]  ;;  %v895_v10 = vpack.c.bf16 %v38_v2, %v37_v1  ;;  %v897_v14 = vpack.c.bf16 %v56_v7, %v55_v6 }
  0x12   :  { %890 = vmatprep.subr.bf16.mxu0 %v889_v52  ;;  %v88_v9 = vld [vmem:[%s1739_s1 + $0x1e8] sm:$0xff]  ;;  %v39_v11 = vld [vmem:[%s1739_s1 + $0x60] sm:$0xff]  ;;  %v927_v13 = vpack.c.bf16 %v70_v5, %v69_v3  ;;  %v57_v19 = vld [vmem:[%s1739_s1 + $0xf0] sm:$0xff] }
  0x13   :  { %920 = vmatpush3.bf16.msra.mxu1 %v919_v51  ;;  %v40_v12 = vld [vmem:[%s1739_s1 + $0x68] sm:$0xff]  ;;  %v71_v15 = vld [vmem:[%s1739_s1 + $0x160] sm:$0xff]  ;;  %v929_v18 = vpack.c.bf16 %v88_v9, %v87_v8  ;;  %v58_v20 = vld [vmem:[%s1739_s1 + $0xf8] sm:$0xff] }
  0x14   :  { %922 = vmatprep.subr.bf16.mxu1 %v921_v56  ;;  %v72_v16 = vld [vmem:[%s1739_s1 + $0x168] sm:$0xff]  ;;  %v18_v21 = vld [vmem:[%s1738_s0 + $0x18] sm:$0xff]  ;;  %v89_v22 = vld [vmem:[%s1739_s1 + $0x1f0] sm:$0xff]  ;;  %v899_v24 = vpack.c.bf16 %v40_v12, %v39_v11  ;;  %v901_v26 = vpack.c.bf16 %v58_v20, %v57_v19 }
  0x15   :  { %892 = vmatpush3.bf16.msra.mxu0 %v891_v62  ;;  %v16_v17 = vld [vmem:[%s1738_s0 + $0x8] sm:$0xff]  ;;  %v90_v23 = vld [vmem:[%s1739_s1 + $0x1f8] sm:$0xff]  ;;  %360 = vmatprep.mubr.f32.mxu1 %v18_v21  ;;  %v931_v25 = vpack.c.bf16 %v72_v16, %v71_v15  ;;  %v41_v27 = vld [vmem:[%s1739_s1 + $0x70] sm:$0xff] }
  0x16   :  { %894 = vmatprep.subr.bf16.mxu0 %v893_v0  ;;  %290 = vmatprep.mubr.f32.mxu0 %v16_v17  ;;  %v42_v28 = vld [vmem:[%s1739_s1 + $0x78] sm:$0xff]  ;;  %v73_v29 = vld [vmem:[%s1739_s1 + $0x170] sm:$0xff]  ;;  %v933_v30 = vpack.c.bf16 %v90_v23, %v89_v22  ;;  %v107_v32 = vld [vmem:[%s1739_s1 + $0x280] sm:$0xff] }
  0x17   :  { %924 = vmatpush3.bf16.msra.mxu1 %v923_v63  ;;  %v74_v31 = vld [vmem:[%s1739_s1 + $0x178] sm:$0xff]  ;;  %v108_v33 = vld [vmem:[%s1739_s1 + $0x288] sm:$0xff]  ;;  %v139_v34 = vld [vmem:[%s1739_s1 + $0x380] sm:$0xff]  ;;  %v903_v36 = vpack.c.bf16 %v42_v28, %v41_v27 }
  0x18   :  { %926 = vmatprep.subr.bf16.mxu1 %v925_v4  ;;  %v140_v35 = vld [vmem:[%s1739_s1 + $0x388] sm:$0xff]  ;;  %v935_v37 = vpack.c.bf16 %v74_v31, %v73_v29  ;;  %v937_v38 = vpack.c.bf16 %v108_v33, %v107_v32  ;;  %v91_v39 = vld [vmem:[%s1739_s1 + $0x200] sm:$0xff]  ;;  %v109_v44 = vld [vmem:[%s1739_s1 + $0x290] sm:$0xff] }
  0x19   :  { %896 = vmatpush3.bf16.msra.mxu0 %v895_v10  ;;  %v92_v40 = vld [vmem:[%s1739_s1 + $0x208] sm:$0xff]  ;;  %v123_v41 = vld [vmem:[%s1739_s1 + $0x300] sm:$0xff]  ;;  %v969_v42 = vpack.c.bf16 %v140_v35, %v139_v34  ;;  %v110_v45 = vld [vmem:[%s1739_s1 + $0x298] sm:$0xff] }
  0x1a   :  { %898 = vmatprep.subr.bf16.mxu0 %v897_v14  ;;  %v124_v43 = vld [vmem:[%s1739_s1 + $0x308] sm:$0xff]  ;;  %v141_v46 = vld [vmem:[%s1739_s1 + $0x390] sm:$0xff]  ;;  %v142_v47 = vld [vmem:[%s1739_s1 + $0x398] sm:$0xff]  ;;  %v939_v49 = vpack.c.bf16 %v92_v40, %v91_v39  ;;  %v941_v52 = vpack.c.bf16 %v110_v45, %v109_v44 }
  0x1b   :  { %928 = vmatpush3.bf16.msra.mxu1 %v927_v13  ;;  %v15_v48 = vld [vmem:[%s1738_s0] sm:$0xff]  ;;  %v17_v50 = vld [vmem:[%s1738_s0 + $0x10] sm:$0xff]  ;;  %v971_v51 = vpack.c.bf16 %v124_v43, %v123_v41  ;;  %v94_v54 = vld [vmem:[%s1739_s1 + $0x218] sm:$0xff]  ;;  %v973_v56 = vpack.c.bf16 %v142_v47, %v141_v46 }
  0x1c   :  { %930 = vmatprep.subr.bf16.mxu1 %v929_v18  ;;  %v93_v53 = vld [vmem:[%s1739_s1 + $0x210] sm:$0xff]  ;;  %v126_v57 = vld [vmem:[%s1739_s1 + $0x318] sm:$0xff]  ;;  %v111_v58 = vld [vmem:[%s1739_s1 + $0x2a0] sm:$0xff] }
  0x1d   :  { %900 = vmatpush3.bf16.msra.mxu0 %v899_v24  ;;  %v125_v55 = vld [vmem:[%s1739_s1 + $0x310] sm:$0xff]  ;;  %v112_v59 = vld [vmem:[%s1739_s1 + $0x2a8] sm:$0xff]  ;;  %v143_v60 = vld [vmem:[%s1739_s1 + $0x3a0] sm:$0xff]  ;;  %v943_v62 = vpack.c.bf16 %v94_v54, %v93_v53 }
  0x1e   :  { %902 = vmatprep.subr.bf16.mxu0 %v901_v26  ;;  %v144_v61 = vld [vmem:[%s1739_s1 + $0x3a8] sm:$0xff]  ;;  %v975_v63 = vpack.c.bf16 %v126_v57, %v125_v55  ;;  %v945_v0 = vpack.c.bf16 %v112_v59, %v111_v58  ;;  %v95_v1 = vld [vmem:[%s1739_s1 + $0x220] sm:$0xff]  ;;  %v113_v6 = vld [vmem:[%s1739_s1 + $0x2b0] sm:$0xff] }
  0x1f   :  { %932 = vmatpush3.bf16.msra.mxu1 %v931_v25  ;;  %v96_v2 = vld [vmem:[%s1739_s1 + $0x228] sm:$0xff]  ;;  %v127_v3 = vld [vmem:[%s1739_s1 + $0x320] sm:$0xff]  ;;  %v977_v4 = vpack.c.bf16 %v144_v61, %v143_v60  ;;  %v114_v7 = vld [vmem:[%s1739_s1 + $0x2b8] sm:$0xff] }
  0x20   :  { %934 = vmatprep.subr.bf16.mxu1 %v933_v30  ;;  %v128_v5 = vld [vmem:[%s1739_s1 + $0x328] sm:$0xff]  ;;  %v145_v8 = vld [vmem:[%s1739_s1 + $0x3b0] sm:$0xff]  ;;  %v146_v9 = vld [vmem:[%s1739_s1 + $0x3b8] sm:$0xff]  ;;  %v947_v10 = vpack.c.bf16 %v96_v2, %v95_v1  ;;  %v949_v12 = vpack.c.bf16 %v114_v7, %v113_v6 }
  0x21   :  { %904 = vmatpush3.bf16.msra.mxu0 %v903_v36  ;;  %v979_v11 = vpack.c.bf16 %v128_v5, %v127_v3  ;;  %v97_v13 = vld [vmem:[%s1739_s1 + $0x230] sm:$0xff]  ;;  %v98_v14 = vld [vmem:[%s1739_s1 + $0x238] sm:$0xff]  ;;  %v981_v16 = vpack.c.bf16 %v146_v9, %v145_v8  ;;  %v115_v18 = vld [vmem:[%s1739_s1 + $0x2c0] sm:$0xff] }
  0x22   :  { %938 = vmatprep.subr.bf16.mxu0 %v937_v38  ;;  %v129_v15 = vld [vmem:[%s1739_s1 + $0x330] sm:$0xff]  ;;  %v130_v17 = vld [vmem:[%s1739_s1 + $0x338] sm:$0xff]  ;;  %v116_v19 = vld [vmem:[%s1739_s1 + $0x2c8] sm:$0xff]  ;;  %v951_v22 = vpack.c.bf16 %v98_v14, %v97_v13 }
  0x23   :  { %936 = vmatpush3.bf16.msra.mxu1 %v935_v37  ;;  %v147_v20 = vld [vmem:[%s1739_s1 + $0x3c0] sm:$0xff]  ;;  %v148_v21 = vld [vmem:[%s1739_s1 + $0x3c8] sm:$0xff]  ;;  %v983_v25 = vpack.c.bf16 %v130_v17, %v129_v15  ;;  %v953_v26 = vpack.c.bf16 %v116_v19, %v115_v18  ;;  %v22_v29 = vld [vmem:[%s1738_s0 + $0x38] sm:$0xff] }
  0x24   :  { %970 = vmatprep.subr.bf16.mxu1 %v969_v42  ;;  %291 = vmatmul.mubr.f32.vlgmr.msra.gmra.mrb[0].mxu0 %v15_v48  ;;  %v99_v23 = vld [vmem:[%s1739_s1 + $0x240] sm:$0xff]  ;;  %v20_v24 = vld [vmem:[%s1738_s0 + $0x28] sm:$0xff]  ;;  %v985_v30 = vpack.c.bf16 %v148_v21, %v147_v20  ;;  %v117_v32 = vld [vmem:[%s1739_s1 + $0x2d0] sm:$0xff] }
  0x25   :  { %940 = vmatpush3.bf16.msra.mxu0 %v939_v49  ;;  %v100_v27 = vld [vmem:[%s1739_s1 + $0x248] sm:$0xff]  ;;  %v131_v28 = vld [vmem:[%s1739_s1 + $0x340] sm:$0xff]  ;;  %v118_v33 = vld [vmem:[%s1739_s1 + $0x2d8] sm:$0xff]  ;;  %430 = vmatprep.mubr.f32.mxu0 %v20_v24 }
  0x26   :  { %361 = vmatmul.mubr.f32.vlgmr.msra.gmra.mrb[0].mxu1 %v17_v50  ;;  %942 = vmatprep.subr.bf16.mxu0 %v941_v52  ;;  %v132_v31 = vld [vmem:[%s1739_s1 + $0x348] sm:$0xff]  ;;  %v149_v34 = vld [vmem:[%s1739_s1 + $0x3d0] sm:$0xff]  ;;  %v150_v35 = vld [vmem:[%s1739_s1 + $0x3d8] sm:$0xff]  ;;  %v955_v36 = vpack.c.bf16 %v100_v27, %v99_v23  ;;  %v957_v38 = vpack.c.bf16 %v118_v33, %v117_v32 }
  0x27   :  { %972 = vmatpush3.bf16.msra.mxu1 %v971_v51  ;;  %500 = vmatprep.mubr.f32.mxu1 %v22_v29  ;;  %v987_v37 = vpack.c.bf16 %v132_v31, %v131_v28  ;;  %v101_v39 = vld [vmem:[%s1739_s1 + $0x250] sm:$0xff]  ;;  %v102_v40 = vld [vmem:[%s1739_s1 + $0x258] sm:$0xff]  ;;  %v989_v42 = vpack.c.bf16 %v150_v35, %v149_v34  ;;  %v119_v44 = vld [vmem:[%s1739_s1 + $0x2e0] sm:$0xff] }
  0x28   :  { %974 = vmatprep.subr.bf16.mxu1 %v973_v56  ;;  %v133_v41 = vld [vmem:[%s1739_s1 + $0x350] sm:$0xff]  ;;  %v134_v43 = vld [vmem:[%s1739_s1 + $0x358] sm:$0xff]  ;;  %v120_v45 = vld [vmem:[%s1739_s1 + $0x2e8] sm:$0xff]  ;;  %v959_v48 = vpack.c.bf16 %v102_v40, %v101_v39 }
  0x29   :  { %944 = vmatpush3.bf16.msra.mxu0 %v943_v62  ;;  %v151_v46 = vld [vmem:[%s1739_s1 + $0x3e0] sm:$0xff]  ;;  %v152_v47 = vld [vmem:[%s1739_s1 + $0x3e8] sm:$0xff]  ;;  %v991_v49 = vpack.c.bf16 %v134_v43, %v133_v41  ;;  %v961_v50 = vpack.c.bf16 %v120_v45, %v119_v44  ;;  %v121_v56 = vld [vmem:[%s1739_s1 + $0x2f0] sm:$0xff] }
  0x2a   :  { %946 = vmatprep.subr.bf16.mxu0 %v945_v0  ;;  %v103_v51 = vld [vmem:[%s1739_s1 + $0x260] sm:$0xff]  ;;  %v104_v52 = vld [vmem:[%s1739_s1 + $0x268] sm:$0xff]  ;;  %v993_v54 = vpack.c.bf16 %v152_v47, %v151_v46  ;;  %v122_v57 = vld [vmem:[%s1739_s1 + $0x2f8] sm:$0xff] }
  0x2b   :  { %976 = vmatpush3.bf16.msra.mxu1 %v975_v63  ;;  %v135_v53 = vld [vmem:[%s1739_s1 + $0x360] sm:$0xff]  ;;  %v136_v55 = vld [vmem:[%s1739_s1 + $0x368] sm:$0xff]  ;;  %v153_v58 = vld [vmem:[%s1739_s1 + $0x3f0] sm:$0xff]  ;;  %v963_v60 = vpack.c.bf16 %v104_v52, %v103_v51  ;;  %v965_v62 = vpack.c.bf16 %v122_v57, %v121_v56 }
  0x2c   :  { %978 = vmatprep.subr.bf16.mxu1 %v977_v4  ;;  %v154_v59 = vld [vmem:[%s1739_s1 + $0x3f8] sm:$0xff]  ;;  %v995_v61 = vpack.c.bf16 %v136_v55, %v135_v53  ;;  %v105_v63 = vld [vmem:[%s1739_s1 + $0x270] sm:$0xff]  ;;  %v171_v4 = vld [vmem:[%s1739_s1 + $0x480] sm:$0xff] }
  0x2d   :  { %948 = vmatpush3.bf16.msra.mxu0 %v947_v10  ;;  %v106_v0 = vld [vmem:[%s1739_s1 + $0x278] sm:$0xff]  ;;  %v137_v1 = vld [vmem:[%s1739_s1 + $0x370] sm:$0xff]  ;;  %v997_v2 = vpack.c.bf16 %v154_v59, %v153_v58  ;;  %v172_v5 = vld [vmem:[%s1739_s1 + $0x488] sm:$0xff] }
  0x2e   :  { %950 = vmatprep.subr.bf16.mxu0 %v949_v12  ;;  %v138_v3 = vld [vmem:[%s1739_s1 + $0x378] sm:$0xff]  ;;  %v203_v6 = vld [vmem:[%s1739_s1 + $0x580] sm:$0xff]  ;;  %v204_v7 = vld [vmem:[%s1739_s1 + $0x588] sm:$0xff]  ;;  %v967_v8 = vpack.c.bf16 %v106_v0, %v105_v63  ;;  %v1001_v10 = vpack.c.bf16 %v172_v5, %v171_v4 }
  0x2f   :  { %980 = vmatpush3.bf16.msra.mxu1 %v979_v11  ;;  %v999_v9 = vpack.c.bf16 %v138_v3, %v137_v1  ;;  %v155_v11 = vld [vmem:[%s1739_s1 + $0x400] sm:$0xff]  ;;  %v156_v12 = vld [vmem:[%s1739_s1 + $0x408] sm:$0xff]  ;;  %v1033_v14 = vpack.c.bf16 %v204_v7, %v203_v6  ;;  %v174_v17 = vld [vmem:[%s1739_s1 + $0x498] sm:$0xff] }
  0x30   :  { %982 = vmatprep.subr.bf16.mxu1 %v981_v16  ;;  %v187_v13 = vld [vmem:[%s1739_s1 + $0x500] sm:$0xff]  ;;  %v188_v15 = vld [vmem:[%s1739_s1 + $0x508] sm:$0xff]  ;;  %v173_v16 = vld [vmem:[%s1739_s1 + $0x490] sm:$0xff]  ;;  %v1003_v21 = vpack.c.bf16 %v156_v12, %v155_v11 }
  0x31   :  { %952 = vmatpush3.bf16.msra.mxu0 %v951_v22  ;;  %v205_v18 = vld [vmem:[%s1739_s1 + $0x590] sm:$0xff]  ;;  %v206_v19 = vld [vmem:[%s1739_s1 + $0x598] sm:$0xff]  ;;  %v19_v20 = vld [vmem:[%s1738_s0 + $0x20] sm:$0xff]  ;;  %v1035_v23 = vpack.c.bf16 %v188_v15, %v187_v13  ;;  %v1005_v24 = vpack.c.bf16 %v174_v17, %v173_v16 }
  0x32   :  { %954 = vmatprep.subr.bf16.mxu0 %v953_v26  ;;  %v21_v22 = vld [vmem:[%s1738_s0 + $0x30] sm:$0xff]  ;;  %v158_v26 = vld [vmem:[%s1739_s1 + $0x418] sm:$0xff]  ;;  %v1037_v28 = vpack.c.bf16 %v206_v19, %v205_v18  ;;  %v176_v31 = vld [vmem:[%s1739_s1 + $0x4a8] sm:$0xff] }
  0x33   :  { %984 = vmatpush3.bf16.msra.mxu1 %v983_v25  ;;  %v157_v25 = vld [vmem:[%s1739_s1 + $0x410] sm:$0xff]  ;;  %v190_v29 = vld [vmem:[%s1739_s1 + $0x518] sm:$0xff]  ;;  %v207_v32 = vld [vmem:[%s1739_s1 + $0x5a0] sm:$0xff] }
  0x34   :  { %986 = vmatprep.subr.bf16.mxu1 %v985_v30  ;;  %v189_v27 = vld [vmem:[%s1739_s1 + $0x510] sm:$0xff]  ;;  %v175_v30 = vld [vmem:[%s1739_s1 + $0x4a0] sm:$0xff]  ;;  %v208_v33 = vld [vmem:[%s1739_s1 + $0x5a8] sm:$0xff]  ;;  %v1007_v35 = vpack.c.bf16 %v158_v26, %v157_v25 }
  0x35   :  { %956 = vmatpush3.bf16.msra.mxu0 %v955_v36  ;;  %v24_v34 = vld [vmem:[%s1738_s0 + $0x48] sm:$0xff]  ;;  %v26_v36 = vld [vmem:[%s1738_s0 + $0x58] sm:$0xff] }
  0x36   :  { %958 = vmatprep.subr.bf16.mxu0 %v957_v38 }
  0x37   :  { %988 = vmatpush3.bf16.msra.mxu1 %v987_v37 }
  0x38   :  { %990 = vmatprep.subr.bf16.mxu1 %v989_v42 }
  0x39   :  { %960 = vmatpush3.bf16.msra.mxu0 %v959_v48 }
  0x3a   :  { %962 = vmatprep.subr.bf16.mxu0 %v961_v50 }
  0x3b   :  { %992 = vmatpush3.bf16.msra.mxu1 %v991_v49 }
  0x3c   :  { %994 = vmatprep.subr.bf16.mxu1 %v993_v54 }
  0x3d   :  { %964 = vmatpush3.bf16.msra.mxu0 %v963_v60 }
  0x3e   :  { %966 = vmatprep.subr.bf16.mxu0 %v965_v62 }
  0x3f   :  { %996 = vmatpush3.bf16.msra.mxu1 %v995_v61 }
  0x40   :  { %998 = vmatprep.subr.bf16.mxu1 %v997_v2 }
  0x41   :  { %968 = vmatpush3.bf16.msra.mxu0 %v967_v8 }
  0x42   :  { %1002 = vmatprep.subr.bf16.mxu0 %v1001_v10 }
  0x43   :  { %1000 = vmatpush3.bf16.msra.mxu1 %v999_v9 }
  0x44   :  { %1034 = vmatprep.subr.bf16.mxu1 %v1033_v14  ;;  %431 = vmatmul.mubr.f32.vlgmr.msra.gmra.mrb[2].mxu0 %v19_v20 }
  0x45   :  { %1004 = vmatpush3.bf16.msra.mxu0 %v1003_v21 }
  0x46   :  { %501 = vmatmul.mubr.f32.vlgmr.msra.gmra.mrb[2].mxu1 %v21_v22 }
  0x47   :  { %8 = vsyncpa [#allocation3], 0  ;;  %1036 = vmatpush3.bf16.msra.mxu1 %v1035_v23  ;;  %1006 = vmatprep.subr.bf16.mxu0 %v1005_v24  ;;  %v1039_v37 = vpack.c.bf16 %v190_v29, %v189_v27  ;;  %v1009_v38 = vpack.c.bf16 %v176_v31, %v175_v30  ;;  %v159_v39 = vld [vmem:[%s1739_s1 + $0x420] sm:$0xff]  ;;  %v160_v40 = vld [vmem:[%s1739_s1 + $0x428] sm:$0xff]  ;;  %v1041_v42 = vpack.c.bf16 %v208_v33, %v207_v32  ;;  %vm646_vm0 = vcmask 261120  }
  0x48   :  { %v191_v41 = vld [vmem:[%s1739_s1 + $0x520] sm:$0xff]  ;;  %1038 = vmatprep.subr.bf16.mxu1 %v1037_v28  ;;  %v192_v43 = vld [vmem:[%s1739_s1 + $0x528] sm:$0xff]  ;;  %v177_v44 = vld [vmem:[%s1739_s1 + $0x4b0] sm:$0xff]  ;;  %570 = vmatprep.mubr.f32.mxu0 %v24_v34  ;;  %v1011_v48 = vpack.c.bf16 %v160_v40, %v159_v39 }
  0x49   :  { %v178_v45 = vld [vmem:[%s1739_s1 + $0x4b8] sm:$0xff]  ;;  %v209_v46 = vld [vmem:[%s1739_s1 + $0x5b0] sm:$0xff]  ;;  %640 = vmatprep.mubr.f32.mxu1 %v26_v36  ;;  %1008 = vmatpush3.bf16.msra.mxu0 %v1007_v35  ;;  %v1043_v49 = vpack.c.bf16 %v192_v43, %v191_v41  ;;  %v179_v56 = vld [vmem:[%s1739_s1 + $0x4c0] sm:$0xff] }
  0x4a   :  { %v210_v47 = vld [vmem:[%s1739_s1 + $0x5b8] sm:$0xff]  ;;  %1010 = vmatprep.subr.bf16.mxu0 %v1009_v38  ;;  %v1013_v50 = vpack.c.bf16 %v178_v45, %v177_v44  ;;  %v161_v51 = vld [vmem:[%s1739_s1 + $0x430] sm:$0xff]  ;;  %v180_v57 = vld [vmem:[%s1739_s1 + $0x4c8] sm:$0xff] }
  0x4b   :  { %1040 = vmatpush3.bf16.msra.mxu1 %v1039_v37  ;;  %v162_v52 = vld [vmem:[%s1739_s1 + $0x438] sm:$0xff]  ;;  %v193_v53 = vld [vmem:[%s1739_s1 + $0x530] sm:$0xff]  ;;  %v1045_v54 = vpack.c.bf16 %v210_v47, %v209_v46  ;;  %v211_v58 = vld [vmem:[%s1739_s1 + $0x5c0] sm:$0xff]  ;;  %v1017_v62 = vpack.c.bf16 %v180_v57, %v179_v56 }
  0x4c   :  { %1042 = vmatprep.subr.bf16.mxu1 %v1041_v42  ;;  %v194_v55 = vld [vmem:[%s1739_s1 + $0x538] sm:$0xff]  ;;  %v212_v59 = vld [vmem:[%s1739_s1 + $0x5c8] sm:$0xff]  ;;  %v1015_v60 = vpack.c.bf16 %v162_v52, %v161_v51  ;;  %v163_v63 = vld [vmem:[%s1739_s1 + $0x440] sm:$0xff] }
  0x4d   :  { %1012 = vmatpush3.bf16.msra.mxu0 %v1011_v48  ;;  %v1047_v61 = vpack.c.bf16 %v194_v55, %v193_v53  ;;  %v164_v0 = vld [vmem:[%s1739_s1 + $0x448] sm:$0xff]  ;;  %v195_v1 = vld [vmem:[%s1739_s1 + $0x540] sm:$0xff]  ;;  %v1049_v2 = vpack.c.bf16 %v212_v59, %v211_v58  ;;  %v181_v4 = vld [vmem:[%s1739_s1 + $0x4d0] sm:$0xff] }
  0x4e   :  { %1014 = vmatprep.subr.bf16.mxu0 %v1013_v50  ;;  %v196_v3 = vld [vmem:[%s1739_s1 + $0x548] sm:$0xff]  ;;  %v182_v5 = vld [vmem:[%s1739_s1 + $0x4d8] sm:$0xff]  ;;  %v213_v6 = vld [vmem:[%s1739_s1 + $0x5d0] sm:$0xff]  ;;  %v1019_v8 = vpack.c.bf16 %v164_v0, %v163_v63 }
  0x4f   :  { %1044 = vmatpush3.bf16.msra.mxu1 %v1043_v49  ;;  %v214_v7 = vld [vmem:[%s1739_s1 + $0x5d8] sm:$0xff]  ;;  %v1051_v9 = vpack.c.bf16 %v196_v3, %v195_v1  ;;  %v1021_v10 = vpack.c.bf16 %v182_v5, %v181_v4  ;;  %v165_v11 = vld [vmem:[%s1739_s1 + $0x450] sm:$0xff]  ;;  %v183_v16 = vld [vmem:[%s1739_s1 + $0x4e0] sm:$0xff] }
  0x50   :  { %1046 = vmatprep.subr.bf16.mxu1 %v1045_v54  ;;  %v166_v12 = vld [vmem:[%s1739_s1 + $0x458] sm:$0xff]  ;;  %v197_v13 = vld [vmem:[%s1739_s1 + $0x550] sm:$0xff]  ;;  %v1053_v14 = vpack.c.bf16 %v214_v7, %v213_v6  ;;  %v184_v17 = vld [vmem:[%s1739_s1 + $0x4e8] sm:$0xff] }
  0x51   :  { %1016 = vmatpush3.bf16.msra.mxu0 %v1015_v60  ;;  %v198_v15 = vld [vmem:[%s1739_s1 + $0x558] sm:$0xff]  ;;  %v215_v18 = vld [vmem:[%s1739_s1 + $0x5e0] sm:$0xff]  ;;  %v216_v19 = vld [vmem:[%s1739_s1 + $0x5e8] sm:$0xff]  ;;  %v1023_v20 = vpack.c.bf16 %v166_v12, %v165_v11  ;;  %v1025_v22 = vpack.c.bf16 %v184_v17, %v183_v16 }
  0x52   :  { %1018 = vmatprep.subr.bf16.mxu0 %v1017_v62  ;;  %v1055_v21 = vpack.c.bf16 %v198_v15, %v197_v13  ;;  %v167_v23 = vld [vmem:[%s1739_s1 + $0x460] sm:$0xff]  ;;  %v168_v24 = vld [vmem:[%s1739_s1 + $0x468] sm:$0xff]  ;;  %v1057_v26 = vpack.c.bf16 %v216_v19, %v215_v18  ;;  %v185_v28 = vld [vmem:[%s1739_s1 + $0x4f0] sm:$0xff] }
  0x53   :  { %1048 = vmatpush3.bf16.msra.mxu1 %v1047_v61  ;;  %v199_v25 = vld [vmem:[%s1739_s1 + $0x560] sm:$0xff]  ;;  %v200_v27 = vld [vmem:[%s1739_s1 + $0x568] sm:$0xff]  ;;  %v186_v29 = vld [vmem:[%s1739_s1 + $0x4f8] sm:$0xff]  ;;  %v1027_v32 = vpack.c.bf16 %v168_v24, %v167_v23 }
  0x54   :  { %1050 = vmatprep.subr.bf16.mxu1 %v1049_v2  ;;  %v217_v30 = vld [vmem:[%s1739_s1 + $0x5f0] sm:$0xff]  ;;  %v218_v31 = vld [vmem:[%s1739_s1 + $0x5f8] sm:$0xff]  ;;  %v1059_v33 = vpack.c.bf16 %v200_v27, %v199_v25  ;;  %v1029_v34 = vpack.c.bf16 %v186_v29, %v185_v28  ;;  %v23_v42 = vld [vmem:[%s1738_s0 + $0x40] sm:$0xff] }
  0x55   :  { %1020 = vmatpush3.bf16.msra.mxu0 %v1019_v8  ;;  %v169_v35 = vld [vmem:[%s1739_s1 + $0x470] sm:$0xff]  ;;  %v170_v36 = vld [vmem:[%s1739_s1 + $0x478] sm:$0xff]  ;;  %v1061_v37 = vpack.c.bf16 %v218_v31, %v217_v30  ;;  %v662_v45 = vld [vmem:[%s1740_s2] ss:$0 sm:$0xff] }
  0x56   :  { %1022 = vmatprep.subr.bf16.mxu0 %v1021_v10  ;;  %v201_v38 = vld [vmem:[%s1739_s1 + $0x570] sm:$0xff]  ;;  %v202_v39 = vld [vmem:[%s1739_s1 + $0x578] sm:$0xff]  ;;  %v1031_v40 = vpack.c.bf16 %v170_v36, %v169_v35 }
  0x57   :  { %1052 = vmatpush3.bf16.msra.mxu1 %v1051_v9  ;;  %v1063_v41 = vpack.c.bf16 %v202_v39, %v201_v38  ;;  %v25_v43 = vld [vmem:[%s1738_s0 + $0x50] sm:$0xff]  ;;  %s1090_s0 = smov [#allocation2]  }
  0x58   :  { %1054 = vmatprep.subr.bf16.mxu1 %v1053_v14  ;;  %s654_s2 = sshll.u32 %s1090_s0, 4  ;;  %s655_s2 = int_to_ptr.vmem [resolvable:$true] %s654_s2 }
  0x59   :  { %1024 = vmatpush3.bf16.msra.mxu0 %v1023_v20  ;;  %s1066_s16 = scalar_lea.vmem %s655_s2, 128  ;;  %p1071_p1 = scmp.lt.s32.totalorder %s655_s2, %s655_s2 }
  0x5a   :  { %1026 = vmatprep.subr.bf16.mxu0 %v1025_v22  ;;  %p1067_p0 = scmp.ne.s32.totalorder %s655_s2, %s1066_s16  ;;  %p1072_p2 = scmp.lt.s32.totalorder %s1066_s16, %s1066_s16 }
  0x5b   :  { %1056 = vmatpush3.bf16.msra.mxu1 %v1055_v21 }
  0x5c   :  { %1058 = vmatprep.subr.bf16.mxu1 %v1057_v26  ;;  %p1073_p3 = por %p1072_p2, %p1071_p1 }
  0x5d   :  { %1028 = vmatpush3.bf16.msra.mxu0 %v1027_v32 }
  0x5e   :  { %1030 = vmatprep.subr.bf16.mxu0 %v1029_v34  ;;  %p1074_p4 = pnand %p1073_p3, %p1067_p0 }
  0x5f   :  { %1060 = vmatpush3.bf16.msra.mxu1 %v1059_v33 }
  0x60   :  { %1062 = vmatprep.subr.bf16.mxu1 %v1061_v37 }
  0x61   :  { %1032 = vmatpush3.bf16.msra.mxu0 %v1031_v40 }
  0x63   :  { %1064 = vmatpush3.bf16.msra.mxu1 %v1063_v41 }
  0x64   :  { %571 = vmatmul.mubr.f32.vlgmr.msra.gmra.mrb[4].mxu0 %v23_v42 }
  0x66   :  { %641 = vmatmul.mubr.f32.vlgmr.msra.gmra.mrb[4].mxu1 %v25_v43 }
  0xf7   :  { %v695_v44 = vpop.f32.mrb[0].mxu0 }
  0xf8   :  { %v696_v46 = vpop.f32.mrb[1].mxu0 }
  0xf9   :  { %v730_v47 = vpop.f32.mrb[0].mxu1  ;;  %v697_v48 = vadd.f32 %v696_v46, %v695_v44 }
  0xfa   :  { %v731_v49 = vpop.f32.mrb[1].mxu1 }
  0xfb   :  { %v732_v50 = vadd.f32 %v731_v49, %v730_v47  ;;  %v293_v51 = vadd.f32 %v697_v48, %v662_v45 }
  0xfd   :  { %v363_v52 = vadd.f32 %v732_v50, %v293_v51 }
 0x117   :  { %v765_v53 = vpop.f32.mrb[2].mxu0 }
 0x118   :  { %v766_v54 = vpop.f32.mrb[3].mxu0 }
 0x119   :  { %v800_v55 = vpop.f32.mrb[2].mxu1  ;;  %v767_v56 = vadd.f32 %v766_v54, %v765_v53 }
 0x11a   :  { %v801_v57 = vpop.f32.mrb[3].mxu1 }
 0x11b   :  { %v802_v58 = vadd.f32 %v801_v57, %v800_v55  ;;  %v433_v59 = vadd.f32 %v767_v56, %v363_v52 }
 0x11d   :  { %v503_v60 = vadd.f32 %v802_v58, %v433_v59 }
 0x137   :  { %v835_v61 = vpop.f32.mrb[4].mxu0 }
 0x138   :  { %v836_v62 = vpop.f32.mrb[5].mxu0 }
 0x139   :  { %v870_v63 = vpop.f32.mrb[4].mxu1  ;;  %v837_v0 = vadd.f32 %v836_v62, %v835_v61 }
 0x13a   :  { %v871_v1 = vpop.f32.mrb[5].mxu1 }
 0x13b   :  { %v872_v2 = vadd.f32 %v871_v1, %v870_v63  ;;  %v573_v3 = vadd.f32 %v837_v0, %v503_v60 }
 0x13d   :  { %v643_v4 = vadd.f32 %v872_v2, %v573_v3 }
 0x13f   :  { %647 = vst.msk [vmem:[#allocation2] sm:$0xff] %vm646_vm0, %v643_v4 }
 0x140   :  { %1077 = shalt.err (!%p1074_p4)
}
 0x141   :  { %s1078_s19 = scalar_lea.hbm %s1741_s3, 128 }
 0x142   :  { %p1079_p5 = scmp.ne.s32.totalorder %s1741_s3, %s1078_s19  ;;  %p1082_p6 = scmp.lt.u32.totalorder %s1078_s19, %s1741_s3 }
 0x144   :  { %p1084_p7 = pnand %p1082_p6, %p1079_p5 }
 0x146   :  { %1087 = shalt.err (!%p1084_p7)
}
 0x147   :  { %657 = dma.vmem_to_hbm [thread:$0]  %s655_s2, 128, %s1741_s3, [#allocation3]  }
 0x148   :  { %1088 = dma.done.wait [#allocation3], 128  }
 0x149   :  { %1089 = vsyncadd [#allocation3], 4294967168 }
 0x14a   :  { %661 = vsyncpa [#allocation3], 1 }

</bundles_post_ra>
